<compile_context>
chip_gen: v6e
topology: v6e:2x2x1
jax: 0.10.0
libtpu: 0.0.40
codegen_flags: <defaults>
</compile_context>

<pallas_src>
import jax
import jax.numpy as jnp
from jax.experimental import pallas as pl
from jax.experimental.pallas import tpu as pltpu


def cnn_im2col_kernel(p_ref, w_ref, b_ref, o_ref):
    # p_ref: (Lout*TILE_B, C*K)  im2col patches, time-major within the word tile
    # w_ref: (C*K, Fp)           conv weight, filters padded to Fp (lane-dense)
    # b_ref: (1, Fp)             bias (padded)
    # o_ref: (TILE_B, Fp)        per-word max over time of conv output (+ bias)
    tb, fp = o_ref.shape
    lout = p_ref.shape[0] // tb

    # Single im2col matmul on the MXU, f32 accumulation.
    acc = jnp.dot(p_ref[...], w_ref[...],
                  preferred_element_type=jnp.float32)       # (Lout*TB, Fp)

    # (Lout*TB, Fp) -> (Lout, TB, Fp) is tile-aligned (TB multiple of 8, Fp=128),
    # so the reshape is a layout no-op and the max over axis 0 is a plain
    # elementwise-maximum chain on the VPU.
    pooled = jnp.max(acc.reshape(lout, tb, fp), axis=0)      # (TB, Fp)

    # Bias is time-invariant: max(conv + b) == max(conv) + b. Add once, store once.
    o_ref[...] = (pooled + b_ref[...]).astype(o_ref.dtype)


def cnn_forward(x, weight, bias, *, padding=1, tile_b=8):
    """x: (B, C, L) f32; weight: (F, C, K); bias: (F,) -> (B, F)."""
    B, C, L = x.shape
    F, _, K = weight.shape
    Lout = L + 2 * padding - K + 1

    # --- layout glue (wrapper): zero pad + im2col + tiling/padding ----------
    xp = jnp.pad(x, ((0, 0), (0, 0), (padding, padding)))    # (B, C, Lp)

    # patches[b, l, c*K + t] = xp[b, c, l + t]
    taps = [xp[:, :, t:t + Lout] for t in range(K)]          # K x (B, C, Lout)
    patches = jnp.stack(taps, axis=-1)                       # (B, C, Lout, K)
    patches = patches.transpose(0, 2, 1, 3).reshape(B, Lout, C * K)

    # pad word/batch axis to a multiple of tile_b (extra rows stripped later)
    n_tiles = (B + tile_b - 1) // tile_b
    Bp = n_tiles * tile_b
    patches = jnp.pad(patches, ((0, Bp - B), (0, 0), (0, 0)))  # (Bp, Lout, CK)

    # group words into tiles and make time the MAJOR axis inside each tile:
    # row index within a tile = l * tile_b + b_local
    patches = patches.reshape(n_tiles, tile_b, Lout, C * K)
    patches = patches.transpose(0, 2, 1, 3).reshape(n_tiles * Lout * tile_b, C * K)

    # lane-dense output: pad the filter axis to a multiple of 128
    Fp = ((F + 127) // 128) * 128
    w2 = jnp.pad(weight.reshape(F, C * K).T, ((0, 0), (0, Fp - F)))  # (C*K, Fp)
    b2 = jnp.pad(bias, (0, Fp - F)).reshape(1, Fp)                   # (1, Fp)

    out = pl.pallas_call(
        cnn_im2col_kernel,
        out_shape=jax.ShapeDtypeStruct((Bp, Fp), x.dtype),
        grid=(n_tiles,),
        in_specs=[
            pl.BlockSpec((tile_b * Lout, C * K), lambda i: (i, 0)),
            pl.BlockSpec((C * K, Fp), lambda i: (0, 0)),
            pl.BlockSpec((1, Fp), lambda i: (0, 0)),
        ],
        out_specs=pl.BlockSpec((tile_b, Fp), lambda i: (i, 0)),
        compiler_params=pltpu.CompilerParams(
            dimension_semantics=("parallel",)),   # shards word tiles across TCs
    )(patches, w2, b2)

    return out[:B, :F]


def cnn_reference(x, weight, bias, *, padding=1):
    """Pure-JAX reference (same semantics as torch Conv1d + max over dim=2)."""
    y = jax.lax.conv_general_dilated(
        x, weight, window_strides=(1,), padding=[(padding, padding)],
        dimension_numbers=("NCH", "OIH", "NCH"))
    y = y + bias[None, :, None]
    return jnp.max(y, axis=2)


if __name__ == "__main__":
    # Module hyperparameters (small, consistent with CNN.__init__)
    char_embed_size = 4     # in_channels
    word_embed_size = 32    # out_channels / num_filters
    max_len = 16            # length of the character sequence
    kernel_size = 5
    padding = 1
    batch = 2

    key = jax.random.PRNGKey(0)
    kx, kw, kb, kx2 = jax.random.split(key, 4)

    bound = 1.0 / jnp.sqrt(jnp.float32(char_embed_size * kernel_size))
    x = jax.random.normal(kx, (batch, char_embed_size, max_len), dtype=jnp.float32)
    weight = jax.random.uniform(
        kw, (word_embed_size, char_embed_size, kernel_size),
        dtype=jnp.float32, minval=-bound, maxval=bound)
    bias = jax.random.uniform(
        kb, (word_embed_size,), dtype=jnp.float32, minval=-bound, maxval=bound)

    out = jax.block_until_ready(cnn_forward(x, weight, bias, padding=padding))
    expected = cnn_reference(x, weight, bias, padding=padding)
    assert out.shape == (batch, word_embed_size)
    assert jnp.allclose(out, expected, atol=1e-4, rtol=1e-4), "mismatch vs reference (small)"

    # Exercise the batched multi-tile grid path (many words per pallas_call).
    x_big = jax.random.normal(kx2, (64, char_embed_size, max_len), dtype=jnp.float32)
    out_big = jax.block_until_ready(cnn_forward(x_big, weight, bias, padding=padding))
    expected_big = cnn_reference(x_big, weight, bias, padding=padding)
    assert jnp.allclose(out_big, expected_big, atol=1e-4, rtol=1e-4), "mismatch vs reference (batched)"

    print("KERNEL_OK")
</pallas_src>

<mosaic_0001>
module attributes {stable_mosaic.version = 11 : i64} {
  func.func @cnn_im2col_kernel(%arg0: i32, %arg1: memref<112x20xf32, #tpu.memory_space<vmem>>, %arg2: memref<20x128xf32, #tpu.memory_space<vmem>>, %arg3: memref<1x128xf32, #tpu.memory_space<vmem>>, %arg4: memref<8x128xf32, #tpu.memory_space<vmem>>) attributes {dimension_semantics = [#tpu.dimension_semantics<parallel>], iteration_bounds = array<i64: 1>, scalar_prefetch = 0 : i64, scratch_operands = 0 : i64, tpu.core_type = #tpu.core_type<tc>, window_params = [{transform_indices = @transform_0, window_bounds = array<i64: 112, 20>}, {pipeline_mode = #tpu.pipeline_mode<synchronous>, transform_indices = @transform_1, window_bounds = array<i64: 20, 128>}, {pipeline_mode = #tpu.pipeline_mode<synchronous>, transform_indices = @transform_2, window_bounds = array<i64: 1, 128>}, {transform_indices = @transform_3, window_bounds = array<i64: 8, 128>}]} {
    %c0 = arith.constant 0 : index
    %c0_0 = arith.constant 0 : index
    %0 = vector.load %arg1[%c0, %c0_0] : memref<112x20xf32, #tpu.memory_space<vmem>>, vector<112x20xf32>
    %c0_1 = arith.constant 0 : index
    %c0_2 = arith.constant 0 : index
    %1 = vector.load %arg2[%c0_1, %c0_2] : memref<20x128xf32, #tpu.memory_space<vmem>>, vector<20x128xf32>
    %cst = arith.constant dense<0.000000e+00> : vector<112x128xf32>
    %2 = tpu.matmul %0, %1, %cst {dimension_numbers = #tpu.dot_dimension_numbers<[1], [0], [0], [1], [0, 0, 1, 1], [], []>} : vector<112x20xf32>, vector<20x128xf32>, vector<112x128xf32> -> vector<112x128xf32>
    %3 = vector.shape_cast %2 : vector<112x128xf32> to vector<14x8x128xf32>
    %cst_3 = arith.constant dense<0xFF800000> : vector<8x128xf32>
    %4 = vector.multi_reduction <maximumf>, %3, %cst_3 [0] : vector<14x8x128xf32> to vector<8x128xf32>
    %c0_4 = arith.constant 0 : index
    %c0_5 = arith.constant 0 : index
    %5 = vector.load %arg3[%c0_4, %c0_5] : memref<1x128xf32, #tpu.memory_space<vmem>>, vector<1x128xf32>
    %6 = vector.broadcast %5 : vector<1x128xf32> to vector<8x128xf32>
    %7 = arith.addf %4, %6 : vector<8x128xf32>
    %c0_6 = arith.constant 0 : index
    %c0_7 = arith.constant 0 : index
    %8 = vector.load %arg4[%c0_6, %c0_7] : memref<8x128xf32, #tpu.memory_space<vmem>>, vector<8x128xf32>
    tpu.vector_store %arg4[%c0_6, %c0_7], %7 {strides = array<i32>} : memref<8x128xf32, #tpu.memory_space<vmem>>, vector<8x128xf32>,
    return
  }
  func.func @transform_0(%arg0: i32) -> (i32, i32) {
    %c0_i32 = arith.constant 0 : i32
    %c0_i32_0 = arith.constant 0 : i32
    return %arg0, %c0_i32 : i32, i32
  }
  func.func @transform_1(%arg0: i32) -> (i32, i32) {
    %c0_i32 = arith.constant 0 : i32
    %c0_i32_0 = arith.constant 0 : i32
    %c0_i32_1 = arith.constant 0 : i32
    return %c0_i32, %c0_i32_0 : i32, i32
  }
  func.func @transform_2(%arg0: i32) -> (i32, i32) {
    %c0_i32 = arith.constant 0 : i32
    %c0_i32_0 = arith.constant 0 : i32
    %c0_i32_1 = arith.constant 0 : i32
    return %c0_i32, %c0_i32_0 : i32, i32
  }
  func.func @transform_3(%arg0: i32) -> (i32, i32) {
    %c0_i32 = arith.constant 0 : i32
    %c0_i32_0 = arith.constant 0 : i32
    return %arg0, %c0_i32 : i32, i32
  }
}

</mosaic_0001>

<bundles_post_ra>
// kernel: tpu_custom_call.1
= control target key start
LH: loop header
LB: loop body
LE: loop exit
PB: predicated region body
PF: predicated region fallthrough
CT: control target
= control target key end

     0   :  { %vm75_vm0 = vcmask 1043456   ;;  %vm32_vm1 = vcmask 162816   ;;  %s431_s0 = inlined_call_operand.vmem [shape: f32[112,20], index: 0, kind: input, shape index: {}]   ;;  %s432_s1 = inlined_call_operand.vmem [shape: f32[20,128], index: 1, kind: input, shape index: {}]   ;;  %s433_s2 = inlined_call_operand.vmem [shape: f32[1,128], index: 2, kind: input, shape index: {}]   ;;  %s434_s3 = inlined_call_operand.hbm [shape: f32[8,128], index: 3, kind: output, shape index: {}]  }
   0x1   :  { %v31_v0 = vld [vmem:[%s432_s1 + $0x10] sm:$0xf]  ;;  %v30_v1 = vld [vmem:[%s432_s1 + $0x8] sm:$0xff]  ;;  %v15_v2 = vld [vmem:[%s431_s0] sm:$0xff] }
   0x2   :  { %283 = vmatprep.subr.msk.mxu0 %vm75_vm0, %v31_v0  ;;  %310 = vmatprep.subr.msk.mxu1 %vm75_vm0, %v31_v0  ;;  %v29_v3 = vld [vmem:[%s432_s1] sm:$0xff]  ;;  %v16_v4 = vld [vmem:[%s431_s0 + $0x8] sm:$0xff]  ;;  %v17_v5 = vld [vmem:[%s431_s0 + $0x10] sm:$0xff] }
   0x3   :  { %284 = vmatpush3.msk.msra.mxu0 %vm75_vm0, %v31_v0  ;;  %313 = vmatpush3.msk.msra.mxu1 %vm75_vm0, %v31_v0  ;;  %v23_v6 = vld [vmem:[%s431_s0 + $0x40] sm:$0xff] }
   0x4   :  { %285 = vmatprep.subr.mxu0 %v30_v1  ;;  %289 = vmatprep.mubr.msk.f32.mxu0 %vm32_vm1, %v15_v2 }
   0x5   :  { %286 = vmatpush3.msra.mxu0 %v30_v1  ;;  %311 = vmatprep.subr.mxu1 %v30_v1 }
   0x6   :  { %287 = vmatprep.subr.mxu0 %v29_v3  ;;  %314 = vmatpush3.msra.mxu1 %v30_v1 }
   0x7   :  { %8 = vsyncpa [#allocation3], 0  ;;  %288 = vmatpush3.msra.mxu0 %v29_v3  ;;  %312 = vmatprep.subr.mxu1 %v29_v3  ;;  %v24_v7 = vld [vmem:[%s431_s0 + $0x48] sm:$0xff]  ;;  %v25_v8 = vld [vmem:[%s431_s0 + $0x50] sm:$0xff]  ;;  %s339_s19 = smov [#allocation2]  }
   0x8   :  { %290 = vmatmul.mubr.msk.f32.vlgmr.msra.gmra.mxu0 %vm32_vm1, %v16_v4  ;;  %315 = vmatpush3.msra.mxu1 %v29_v3  ;;  %v18_v9 = vld [vmem:[%s431_s0 + $0x18] sm:$0xff]  ;;  %v19_v10 = vld [vmem:[%s431_s0 + $0x20] sm:$0xff]  ;;  %v20_v13 = vld [vmem:[%s431_s0 + $0x28] sm:$0xff]  ;;  %s242_s20 = sshll.u32 %s339_s19, 4  ;;  %s243_s20 = int_to_ptr.vmem [resolvable:$true] %s242_s20 }
   0x9   :  { %292 = vmatprep.mubr.msk.f32.mxu0 %vm32_vm1, %v17_v5  ;;  %301 = vmatprep.mubr.msk.f32.mxu1 %vm32_vm1, %v23_v6  ;;  %v26_v11 = vld [vmem:[%s431_s0 + $0x58] sm:$0xff]  ;;  %v27_v12 = vld [vmem:[%s431_s0 + $0x60] sm:$0xff]  ;;  %v21_v14 = vld [vmem:[%s431_s0 + $0x30] sm:$0xff]  ;;  %s317_s21 = scalar_lea.vmem %s243_s20, 128  ;;  %p322_p1 = scmp.lt.s32.totalorder %s243_s20, %s243_s20 }
   0xa   :  { %302 = vmatmul.mubr.msk.f32.vlgmr.msra.gmra.mxu1 %vm32_vm1, %v24_v7  ;;  %v28_v15 = vld [vmem:[%s431_s0 + $0x68] sm:$0xff]  ;;  %v22_v16 = vld [vmem:[%s431_s0 + $0x38] sm:$0xff]  ;;  %v265_v43 = vld [vmem:[%s433_s2] ss:$0 sm:$0xff]  ;;  %p318_p0 = scmp.ne.s32.totalorder %s243_s20, %s317_s21  ;;  %p323_p2 = scmp.lt.s32.totalorder %s317_s21, %s317_s21 }
   0xb   :  { %304 = vmatprep.mubr.msk.f32.mxu1 %vm32_vm1, %v25_v8 }
   0xc   :  { %293 = vmatmul.mubr.msk.f32.gmra.mxu0 %vm32_vm1, %v18_v9  ;;  %p324_p3 = por %p323_p2, %p322_p1 }
   0xd   :  { %295 = vmatprep.mubr.msk.f32.mxu0 %vm32_vm1, %v19_v10 }
   0xe   :  { %305 = vmatmul.mubr.msk.f32.gmra.mxu1 %vm32_vm1, %v26_v11  ;;  %p325_p4 = pnand %p324_p3, %p318_p0 }
   0xf   :  { %307 = vmatprep.mubr.msk.f32.mxu1 %vm32_vm1, %v27_v12 }
  0x10   :  { %296 = vmatmul.mubr.msk.f32.gmra.mxu0 %vm32_vm1, %v20_v13 }
  0x11   :  { %298 = vmatprep.mubr.msk.f32.mxu0 %vm32_vm1, %v21_v14 }
  0x12   :  { %308 = vmatmul.mubr.msk.f32.gmra.mxu1 %vm32_vm1, %v28_v15 }
  0x14   :  { %299 = vmatmul.mubr.msk.f32.gmra.mxu0 %vm32_vm1, %v22_v16 }
  0xc8   :  { %v291_v17 = vpop.f32.mrf.mxu0 }
  0xca   :  { %v145_v18 = vpop.f32.mrf.mxu0  ;;  %v303_v19 = vpop.f32.mrf.mxu1 }
  0xcc   :  { %v294_v20 = vpop.f32.mrf.mxu0  ;;  %v185_v21 = vpop.f32.mrf.mxu1 }
  0xce   :  { %v155_v22 = vpop.f32.mrf.mxu0  ;;  %v306_v23 = vpop.f32.mrf.mxu1 }
  0xd0   :  { %v297_v24 = vpop.f32.mrf.mxu0  ;;  %v195_v25 = vpop.f32.mrf.mxu1 }
  0xd1   :  { %v215_v26 = vmax.f32 %v291_v17, %v297_v24 }
  0xd2   :  { %v165_v27 = vpop.f32.mrf.mxu0  ;;  %v309_v28 = vpop.f32.mrf.mxu1 }
  0xd3   :  { %v214_v29 = vmax.f32 %v145_v18, %v165_v27  ;;  %v219_v33 = vmax.f32 %v215_v26, %v303_v19 }
  0xd4   :  { %v300_v30 = vpop.f32.mrf.mxu0  ;;  %v205_v31 = vpop.f32.mrf.mxu1 }
  0xd5   :  { %v217_v32 = vmax.f32 %v294_v20, %v300_v30  ;;  %v218_v34 = vmax.f32 %v214_v29, %v185_v21  ;;  %v223_v39 = vmax.f32 %v219_v33, %v309_v28 }
  0xd6   :  { %v175_v35 = vpop.f32.mrf.mxu0 }
  0xd7   :  { %v216_v36 = vmax.f32 %v155_v22, %v175_v35  ;;  %v222_v37 = vmax.f32 %v218_v34, %v205_v31  ;;  %v221_v38 = vmax.f32 %v217_v32, %v306_v23 }
  0xd9   :  { %v220_v40 = vmax.f32 %v216_v36, %v195_v25  ;;  %v224_v42 = vmax.f32 %v222_v37, %v223_v39 }
  0xdb   :  { %v225_v41 = vmax.f32 %v220_v40, %v221_v38 }
  0xdd   :  { %v226_v44 = vmax.f32 %v224_v42, %v225_v41 }
  0xdf   :  { %v234_v45 = vadd.f32 %v265_v43, %v226_v44 }
  0xe1   :  { %235 = vst [vmem:[#allocation2] sm:$0xff] %v234_v45 }
  0xe2   :  { %328 = shalt.err (!%p325_p4)
}
  0xe3   :  { %245 = dma.vmem_to_hbm [thread:$0]  %s243_s20, 128, %s434_s3, [#allocation3]  }
  0xe4   :  { %337 = dma.done.wait [#allocation3], 128  }
  0xe5   :  { %338 = vsyncadd [#allocation3], 4294967168 }
  0xe6   :  { %249 = vsyncpa [#allocation3], 1 }

</bundles_post_ra>
